<compile_context>
chip_gen: v7x
topology: tpu7x:2x2x1
jax: 0.10.0
libtpu: 0.0.40
codegen_flags: <defaults>
</compile_context>

<pallas_src>
import jax
import jax.numpy as jnp
from jax.experimental import pallas as pl
from jax.experimental.pallas import tpu as pltpu


def _round_up(x, m):
    return ((x + m - 1) // m) * m


def _softmax_error_kernel(logits_ref, tgt_ref, err_ref, onehot_ref):
    # logits_ref: (C, TP) f32, tgt_ref: (1, TP) i32  (class-major, lane-dense).
    x = logits_ref[...]
    C, TP = x.shape
    m = jnp.max(x, axis=0, keepdims=True)
    e = jnp.exp(x - m)
    denom = jnp.sum(e, axis=0, keepdims=True)
    probs = e * pl.reciprocal(denom, approx=True)          # divide on the EUP
    class_ids = jax.lax.broadcasted_iota(jnp.int32, (C, TP), 0)
    onehot = (class_ids == tgt_ref[...]).astype(jnp.float32)
    err_ref[...] = jnp.abs(onehot - probs)
    onehot_ref[...] = onehot.astype(onehot_ref.dtype)


def _lovasz_loss_kernel(err_ref, gt_ref, gts_ref, tri_ref, loss_ref,
                        cum_carry, jac_carry):
    # err_ref: (C, TK) f32 sorted desc per class; gt_ref: (C, TK) bf16 in {0,1}
    # gts_ref: (C, 1) f32 total positives per class; tri_ref: (TK, TK) bf16.
    k = pl.program_id(0)
    C, TK = err_ref.shape

    @pl.when(k == 0)
    def _():
        loss_ref[...] = jnp.zeros_like(loss_ref)
        cum_carry[...] = jnp.zeros_like(cum_carry)
        jac_carry[...] = jnp.zeros_like(jac_carry)

    gt = gt_ref[...]
    err = err_ref[...]
    gts = gts_ref[...]

    # Chunk-local inclusive cumsum on the MXU (bf16 0/1 inputs are exact),
    # plus the running prefix carried from previous chunks.
    local_cum = jnp.dot(gt, tri_ref[...], preferred_element_type=jnp.float32)
    cum_gt = local_cum + cum_carry[...]

    # cumsum(1 - gt)[j] == (j + 1) - cumsum(gt)[j]  -> no second matmul.
    col = jax.lax.broadcasted_iota(jnp.float32, (1, TK), 1)
    pos1 = col + (k * TK + 1).astype(jnp.float32)
    cum_not = pos1 - cum_gt

    intersection = gts - cum_gt
    union = gts + cum_not                                   # always >= 1
    jaccard = 1.0 - intersection * pl.reciprocal(union, approx=True)

    # grad[j] = jaccard[j] - jaccard[j-1]; across the chunk boundary use the
    # carried last jaccard of the previous chunk (0 for the very first chunk).
    prev = pltpu.roll(jaccard, shift=1, axis=1)
    col_i = jax.lax.broadcasted_iota(jnp.int32, (C, TK), 1)
    prev = jnp.where(col_i == 0, jac_carry[...], prev)
    grad = jaccard - prev

    loss_ref[...] += jnp.sum(err * grad, axis=1, keepdims=True)

    cum_carry[...] = cum_gt[:, TK - 1:TK]
    jac_carry[...] = jaccard[:, TK - 1:TK]


def lovasz_softmax(logits, targets, reduction="mean", tp=512, tk=512):
    """logits: (N, C, H, W) float, targets: (N, H, W) int. Returns loss."""
    N, C, H, W = logits.shape
    P = N * H * W

    # Class-major (C, P): pixels on lanes -> lane-dense loads/stores.
    x = jnp.transpose(logits, (1, 0, 2, 3)).reshape(C, P).astype(jnp.float32)
    t = targets.reshape(1, P).astype(jnp.int32)

    # ---- Kernel 1: softmax + |onehot - prob|, tiled over pixels --------------
    tp = min(tp, _round_up(P, 128))
    P1 = _round_up(P, tp)
    if P1 != P:
        x = jnp.pad(x, ((0, 0), (0, P1 - P)))
        t = jnp.pad(t, ((0, 0), (0, P1 - P)), constant_values=-1)

    err, onehot = pl.pallas_call(
        _softmax_error_kernel,
        out_shape=(
            jax.ShapeDtypeStruct((C, P1), jnp.float32),
            jax.ShapeDtypeStruct((C, P1), jnp.bfloat16),
        ),
        grid=(P1 // tp,),
        in_specs=[
            pl.BlockSpec((C, tp), lambda i: (0, i)),
            pl.BlockSpec((1, tp), lambda i: (0, i)),
        ],
        out_specs=(
            pl.BlockSpec((C, tp), lambda i: (0, i)),
            pl.BlockSpec((C, tp), lambda i: (0, i)),
        ),
        compiler_params=pltpu.CompilerParams(
            dimension_semantics=("parallel",)),
    )(x, t)

    if P1 != P:
        err = err[:, :P]
        onehot = onehot[:, :P]

    # TODO(synk): torch.sort (per-class descending sort + gather of the one-hot
    # targets) has no clean Pallas TPU equivalent; the sort stays in XLA glue.
    order = jnp.argsort(-err, axis=1)
    err_s = jnp.take_along_axis(err, order, axis=1)              # (C, P) f32
    gt_s = jnp.take_along_axis(onehot, order, axis=1)            # (C, P) bf16
    gts = jnp.sum(onehot.astype(jnp.float32), axis=1, keepdims=True)  # (C, 1)

    # ---- Kernel 2: blocked Lovasz-gradient scan over pixel chunks ------------
    tk = min(tk, _round_up(P, 128))      # tri tile <= 512 KiB bf16 (v7x-safe)
    P2 = _round_up(P, tk)
    if P2 != P:
        # Padding with (err=0, gt=0) AFTER the sort leaves the loss unchanged:
        # gts and all earlier cumsums are untouched and err=0 contributes 0.
        err_s = jnp.pad(err_s, ((0, 0), (0, P2 - P)))
        gt_s = jnp.pad(gt_s, ((0, 0), (0, P2 - P)))

    tri = (jnp.arange(tk)[:, None] <= jnp.arange(tk)[None, :]).astype(jnp.bfloat16)

    losses = pl.pallas_call(
        _lovasz_loss_kernel,
        out_shape=jax.ShapeDtypeStruct((C, 1), jnp.float32),
        grid=(P2 // tk,),
        in_specs=[
            pl.BlockSpec((C, tk), lambda k: (0, k)),     # sorted errors
            pl.BlockSpec((C, tk), lambda k: (0, k)),     # sorted one-hot (bf16)
            pl.BlockSpec((C, 1), lambda k: (0, 0)),      # per-class totals
            pl.BlockSpec((tk, tk), lambda k: (0, 0)),    # tri tile, DMA'd once
        ],
        out_specs=pl.BlockSpec((C, 1), lambda k: (0, 0)),
        scratch_shapes=[
            pltpu.VMEM((C, 1), jnp.float32),   # running cumsum(gt) prefix
            pltpu.VMEM((C, 1), jnp.float32),   # last jaccard of previous chunk
        ],
        compiler_params=pltpu.CompilerParams(
            dimension_semantics=("arbitrary",)),
    )(err_s, gt_s, gts, tri)[:, 0]

    if reduction == "none":
        return losses
    elif reduction == "sum":
        return jnp.sum(losses)
    else:  # 'mean' (default)
        return jnp.mean(losses)


def _reference(logits, targets):
    """Pure-JAX mirror of the PyTorch module for verification."""
    N, C, H, W = logits.shape
    probs = jax.nn.softmax(logits.astype(jnp.float32), axis=1)
    x = jnp.transpose(probs, (0, 2, 3, 1)).reshape(-1, C)
    t = targets.reshape(-1)
    losses = []
    for c in range(C):
        tc = (t == c).astype(jnp.float32)
        ec = jnp.abs(tc - x[:, c])
        order = jnp.argsort(-ec)
        es = ec[order]
        ts = tc[order]
        gts = ts.sum()
        inter = gts - jnp.cumsum(ts)
        union = gts + jnp.cumsum(1.0 - ts)
        jac = 1.0 - inter / union
        grad = jnp.concatenate([jac[:1], jac[1:] - jac[:-1]])
        losses.append(jnp.dot(es, grad))
    return jnp.mean(jnp.stack(losses))


if __name__ == "__main__":
    key = jax.random.PRNGKey(0)
    k1, k2 = jax.random.split(key)
    N, C, H, W = 2, 4, 16, 16
    logits = jax.random.normal(k1, (N, C, H, W), dtype=jnp.float32)
    targets = jax.random.randint(k2, (N, H, W), 0, C, dtype=jnp.int32)

    loss = lovasz_softmax(logits, targets, reduction="mean")
    loss = jax.block_until_ready(loss)

    ref = jax.block_until_ready(_reference(logits, targets))
    # Tolerance allows for the EUP approximate reciprocals in both kernels.
    assert abs(float(loss) - float(ref)) < 3e-3, (float(loss), float(ref))
    print("KERNEL_OK")
</pallas_src>

<mosaic_0001>
module attributes {stable_mosaic.version = 11 : i64} {
  func.func @_softmax_error_kernel(%arg0: i32, %arg1: memref<4x512xf32, #tpu.memory_space<vmem>>, %arg2: memref<1x512xi32, #tpu.memory_space<vmem>>, %arg3: memref<4x512xf32, #tpu.memory_space<vmem>>, %arg4: memref<4x512xbf16, #tpu.memory_space<vmem>>) attributes {dimension_semantics = [#tpu.dimension_semantics<parallel>], iteration_bounds = array<i64: 1>, scalar_prefetch = 0 : i64, scratch_operands = 0 : i64, tpu.core_type = #tpu.core_type<tc>, window_params = [{transform_indices = @transform_0, window_bounds = array<i64: 4, 512>}, {transform_indices = @transform_1, window_bounds = array<i64: 1, 512>}, {transform_indices = @transform_2, window_bounds = array<i64: 4, 512>}, {transform_indices = @transform_3, window_bounds = array<i64: 4, 512>}]} {
    %c0 = arith.constant 0 : index
    %c0_0 = arith.constant 0 : index
    %0 = vector.load %arg1[%c0, %c0_0] : memref<4x512xf32, #tpu.memory_space<vmem>>, vector<4x512xf32>
    %cst = arith.constant dense<0xFF800000> : vector<512xf32>
    %1 = vector.multi_reduction <maximumf>, %0, %cst [0] : vector<4x512xf32> to vector<512xf32>
    %2 = vector.shape_cast %1 : vector<512xf32> to vector<1x512xf32>
    %3 = vector.broadcast %2 : vector<1x512xf32> to vector<4x512xf32>
    %4 = arith.subf %0, %3 : vector<4x512xf32>
    %5 = math.exp %4 : vector<4x512xf32>
    %cst_1 = arith.constant dense<0.000000e+00> : vector<512xf32>
    %6 = vector.multi_reduction <add>, %5, %cst_1 [0] : vector<4x512xf32> to vector<512xf32>
    %7 = vector.shape_cast %6 : vector<512xf32> to vector<1x512xf32>
    %8 = tpu.reciprocal %7 {approx = true} : vector<1x512xf32> -> vector<1x512xf32>
    %9 = vector.broadcast %8 : vector<1x512xf32> to vector<4x512xf32>
    %10 = arith.mulf %5, %9 : vector<4x512xf32>
    %11 = tpu.iota {dimensions = array<i32: 0>} : vector<4x512xi32>
    %c0_2 = arith.constant 0 : index
    %c0_3 = arith.constant 0 : index
    %12 = vector.load %arg2[%c0_2, %c0_3] : memref<1x512xi32, #tpu.memory_space<vmem>>, vector<1x512xi32>
    %13 = vector.broadcast %12 : vector<1x512xi32> to vector<4x512xi32>
    %14 = arith.cmpi eq, %11, %13 : vector<4x512xi32>
    %15 = arith.extui %14 : vector<4x512xi1> to vector<4x512xi32>
    %16 = arith.sitofp %15 : vector<4x512xi32> to vector<4x512xf32>
    %17 = arith.subf %16, %10 : vector<4x512xf32>
    %18 = math.absf %17 : vector<4x512xf32>
    %c0_4 = arith.constant 0 : index
    %c0_5 = arith.constant 0 : index
    %19 = vector.load %arg3[%c0_4, %c0_5] : memref<4x512xf32, #tpu.memory_space<vmem>>, vector<4x512xf32>
    tpu.vector_store %arg3[%c0_4, %c0_5], %18 {strides = array<i32>} : memref<4x512xf32, #tpu.memory_space<vmem>>, vector<4x512xf32>,
    %20 = arith.truncf %16 : vector<4x512xf32> to vector<4x512xbf16>
    %c0_6 = arith.constant 0 : index
    %c0_7 = arith.constant 0 : index
    %21 = vector.load %arg4[%c0_6, %c0_7] : memref<4x512xbf16, #tpu.memory_space<vmem>>, vector<4x512xbf16>
    tpu.vector_store %arg4[%c0_6, %c0_7], %20 {strides = array<i32>} : memref<4x512xbf16, #tpu.memory_space<vmem>>, vector<4x512xbf16>,
    return
  }
  func.func @transform_0(%arg0: i32) -> (i32, i32) {
    %c0_i32 = arith.constant 0 : i32
    %c0_i32_0 = arith.constant 0 : i32
    return %c0_i32, %arg0 : i32, i32
  }
  func.func @transform_1(%arg0: i32) -> (i32, i32) {
    %c0_i32 = arith.constant 0 : i32
    %c0_i32_0 = arith.constant 0 : i32
    return %c0_i32, %arg0 : i32, i32
  }
  func.func @transform_2(%arg0: i32) -> (i32, i32) {
    %c0_i32 = arith.constant 0 : i32
    %c0_i32_0 = arith.constant 0 : i32
    return %c0_i32, %arg0 : i32, i32
  }
  func.func @transform_3(%arg0: i32) -> (i32, i32) {
    %c0_i32 = arith.constant 0 : i32
    %c0_i32_0 = arith.constant 0 : i32
    return %c0_i32, %arg0 : i32, i32
  }
}

</mosaic_0001>

<bundles_post_ra>
// kernel: tpu_custom_call.1
= control target key start
LH: loop header
LB: loop body
LE: loop exit
PB: predicated region body
PF: predicated region fallthrough
CT: control target
= control target key end

     0   :  { %9 = vsyncpa [#allocation3], 0  ;;  %s482_s0 = inlined_call_operand.hbm [shape: f32[4,512], index: 0, kind: input, shape index: {}]   ;;  %s483_s1 = inlined_call_operand.hbm [shape: s32[1,512], index: 1, kind: input, shape index: {}]   ;;  %s484_s2 = inlined_call_operand.hbm [shape: f32[4,512], index: 2, kind: output, shape index: {0}]   ;;  %s485_s3 = inlined_call_operand.hbm [shape: bf16[4,512], index: 3, kind: output, shape index: {1}]  }
   0x1   :  { %10 = vsyncpa [#allocation6], 0 }
   0x2   :  { %11 = vsyncpa [#allocation4], 0 }
   0x3   :  { %12 = vsyncpa [#allocation9], 0  ;;  %s372_s12 = smov [#allocation2]   ;;  %s373_s14 = smov [#allocation5]  }
   0x4   :  { %s19_s13 = sshll.u32 %s372_s12, 4  ;;  %s29_s15 = sshll.u32 %s373_s14, 4  ;;  %s20_s13 = int_to_ptr.vmem [resolvable:$true] %s19_s13  ;;  %s30_s15 = int_to_ptr.vmem [resolvable:$true] %s29_s15 }
   0x5   :  { %s276_s18 = scalar_lea.hbm %s482_s0, 256 }
   0x6   :  { %p277_p0 = scmp.ne.s32.totalorder %s482_s0, %s276_s18  ;;  %p280_p1 = scmp.lt.u32.totalorder %s276_s18, %s482_s0 }
   0x8   :  { %p282_p2 = pnand %p280_p1, %p277_p0 }
   0xa   :  { %285 = shalt.err (!%p282_p2)
}
   0xb   :  { %s286_s23 = scalar_lea.vmem %s20_s13, 256  ;;  %p291_p4 = scmp.lt.s32.totalorder %s20_s13, %s20_s13 }
   0xc   :  { %p287_p3 = scmp.ne.s32.totalorder %s20_s13, %s286_s23  ;;  %p292_p5 = scmp.lt.s32.totalorder %s286_s23, %s286_s23 }
   0xe   :  { %p293_p6 = por %p292_p5, %p291_p4 }
  0x10   :  { %p294_p7 = pnand %p293_p6, %p287_p3 }
  0x12   :  { %297 = shalt.err (!%p294_p7)
}
  0x13   :  { %22 = dma.hbm_to_vmem [thread:$0]  %s482_s0, 256, %s20_s13, [#allocation3]  }
  0x14   :  { %s298_s28 = scalar_lea.hbm %s483_s1, 64 }
  0x15   :  { %p299_p8 = scmp.ne.s32.totalorder %s483_s1, %s298_s28  ;;  %p302_p9 = scmp.lt.u32.totalorder %s298_s28, %s483_s1 }
  0x17   :  { %p304_p10 = pnand %p302_p9, %p299_p8 }
  0x19   :  { %307 = shalt.err (!%p304_p10)
}
  0x1a   :  { %s308_s6 = scalar_lea.vmem %s30_s15, 64  ;;  %p313_p12 = scmp.lt.s32.totalorder %s30_s15, %s30_s15 }
  0x1b   :  { %p309_p11 = scmp.ne.s32.totalorder %s30_s15, %s308_s6  ;;  %p314_p13 = scmp.lt.s32.totalorder %s308_s6, %s308_s6 }
  0x1d   :  { %p315_p0 = por %p314_p13, %p313_p12 }
  0x1f   :  { %p316_p1 = pnand %p315_p0, %p309_p11 }
  0x21   :  { %319 = shalt.err (!%p316_p1)
}
  0x22   :  { %32 = dma.hbm_to_vmem [thread:$0]  %s483_s1, 64, %s30_s15, [#allocation6]  }
  0x23   :  { %364 = dma.done.wait [#allocation3], 256  }
  0x24   :  { %365 = vsyncadd [#allocation3], 4294967040 }
  0x25   :  { %366 = dma.done.wait [#allocation6], 64  }
  0x26   :  { %367 = vsyncadd [#allocation6], 4294967232  ;;  %v138_v0 = vlaneseq  ;;  %v374_v1 = vmov 1983009808   ;;  %vm47_vm0 = vcmask 1043456   ;;  %v422_v8 = vld [vmem:[#allocation2] sm:$0xff] }
  0x27   :  { %v204_v2 = vunpack.c.l.s4 %v374_v1  ;;  %v140_v9 = vld [vmem:[#allocation5] sm:$0xf]  ;;  %v424_v10 = vld [vmem:[#allocation2 + $0x8] sm:$0xff]  ;;  %v43_v13 = vcombine.high %v422_v8, %v422_v8  ;;  %v48_v14 = vsel %vm47_vm0, %v422_v8, -inf  ;;  %v375_v25 = vmov 0.0   ;;  %s376_s1 = smov [#allocation8]  }
  0x28   :  { %v139_v3 = vshrl.u32 %v138_v0, 7  ;;  %v49_v17 = vrot.slane %v48_v14, 4  ;;  %v44_v18 = vcombine.high %v424_v10, %v424_v10  ;;  %v62_v19 = vsel %vm47_vm0, %v424_v10, -inf  ;;  %s236_s8 = sshll.u32 %s376_s1, 4  ;;  %s237_s8 = int_to_ptr.vmem [resolvable:$true] %s236_s8 }
  0x29   :  { %v205_v4 = vunpack.c.0.s8 %v204_v2  ;;  %v55_v21 = vsel %vm47_vm0, %v43_v13, -inf  ;;  %v63_v22 = vrot.slane %v62_v19, 4  ;;  %s320_s9 = scalar_lea.vmem %s237_s8, 128  ;;  %p325_p3 = scmp.lt.s32.totalorder %s237_s8, %s237_s8 }
  0x2a   :  { %v143_v5 = vsub.s32 0, %v139_v3  ;;  %v147_v6 = vsub.s32 1, %v139_v3  ;;  %v151_v7 = vsub.s32 2, %v139_v3  ;;  %v155_v11 = vsub.s32 3, %v139_v3  ;;  %p321_p2 = scmp.ne.s32.totalorder %s237_s8, %s320_s9  ;;  %p326_p4 = scmp.lt.s32.totalorder %s320_s9, %s320_s9 }
  0x2b   :  { %v208_v12 = vsub.s32 %v205_v4, %v139_v3  ;;  %v50_v23 = vmax.f32 %v48_v14, %v49_v17  ;;  %v56_v24 = vrot.slane %v55_v21, 4  ;;  %v64_v28 = vmax.f32 %v62_v19, %v63_v22 }
  0x2c   :  { %v144_v15 = vrot.slane %v140_v9, %v143_v5  ;;  %v148_v16 = vrot.slane %v140_v9, %v147_v6  ;;  %v152_v20 = vrot.slane %v140_v9, %v151_v7  ;;  %v69_v29 = vsel %vm47_vm0, %v44_v18, -inf  ;;  %p327_p5 = por %p326_p4, %p325_p3 }
  0x2d   :  { %v156_v30 = vrot.slane %v140_v9, %v155_v11  ;;  %v51_v31 = vrot.slane %v50_v23, 2  ;;  %v57_v32 = vmax.f32 %v55_v21, %v56_v24  ;;  %v70_v33 = vrot.slane %v69_v29, 4 }
  0x2e   :  { %vm157_vm1 = vcmp.eq.s32.totalorder %v139_v3, %v144_v15  ;;  %vm158_vm2 = vcmp.eq.s32.totalorder %v139_v3, %v148_v16  ;;  %vm159_vm3 = vcmp.eq.s32.totalorder %v139_v3, %v152_v20  ;;  %v65_v35 = vrot.slane %v64_v28, 2  ;;  %p328_p6 = pnand %p327_p5, %p321_p2 }
  0x2f   :  { %v435_v26 = vsel %vm157_vm1, 1.0, %v375_v25  ;;  %v437_v27 = vsel %vm158_vm2, 1.0, %v375_v25  ;;  %v440_v34 = vsel %vm159_vm3, 1.0, %v375_v25  ;;  %vm160_vm4 = vcmp.eq.s32.totalorder %v139_v3, %v156_v30 }
  0x30   :  { %v254_v36 = vpack.c.bf16 %v437_v27, %v435_v26  ;;  %v52_v37 = vmax.f32 %v50_v23, %v51_v31  ;;  %v58_v38 = vrot.slane %v57_v32, 2  ;;  %v71_v39 = vmax.f32 %v69_v29, %v70_v33 }
  0x31   :  { %v444_v40 = vsel %vm160_vm4, 1.0, %v375_v25  ;;  %v66_v41 = vmax.f32 %v64_v28, %v65_v35 }
  0x32   :  { %v255_v42 = vpack.c.bf16 %v444_v40, %v440_v34  ;;  %v209_v43 = vrot.slane %v254_v36, %v208_v12  ;;  %v53_v44 = vrot.slane %v52_v37, 1  ;;  %v59_v45 = vmax.f32 %v57_v32, %v58_v38 }
  0x33   :  { %v72_v46 = vrot.slane %v71_v39, 2  ;;  %v67_v47 = vrot.slane %v66_v41, 1 }
  0x34   :  { %v216_v48 = vrot.slane %v255_v42, %v208_v12  ;;  %v54_v49 = vmax.f32 %v52_v37, %v53_v44  ;;  %v60_v50 = vrot.slane %v59_v45, 1 }
  0x35   :  { %v73_v51 = vmax.f32 %v71_v39, %v72_v46  ;;  %v68_v54 = vmax.f32 %v66_v41, %v67_v47 }
  0x36   :  { %v217_v52 = vcombine.low %v209_v43, %v216_v48  ;;  %v61_v53 = vmax.f32 %v59_v45, %v60_v50 }
  0x37   :  { %v74_v55 = vrot.slane %v73_v51, 1 }
  0x38   :  { %219 = vst [vmem:[#allocation8] sm:$0xff] %v217_v52  ;;  %v80_v56 = vcombine.low %v54_v49, %v61_v53 }
  0x39   :  { %v75_v57 = vmax.f32 %v73_v51, %v74_v55 }
  0x3a   :  { %331 = shalt.err (!%p328_p6)
}
  0x3b   :  { %s332_s12 = scalar_lea.hbm %s485_s3, 128 }
  0x3c   :  { %p333_p7 = scmp.ne.s32.totalorder %s485_s3, %s332_s12  ;;  %p336_p8 = scmp.lt.u32.totalorder %s332_s12, %s485_s3 }
  0x3e   :  { %p338_p9 = pnand %p336_p8, %p333_p7 }
  0x40   :  { %341 = shalt.err (!%p338_p9)
}
  0x41   :  { %239 = dma.vmem_to_hbm [thread:$0]  %s237_s8, 128, %s485_s3, [#allocation9]   ;;  %v84_v58 = vsub.f32 %v422_v8, %v80_v56  ;;  %v81_v59 = vcombine.low %v68_v54, %v75_v57 }
  0x42   :  { %s377_s3 = smov [#allocation7]  }
  0x43   :  { %v86_v60 = vmul.f32 1.442695, %v84_v58  ;;  %v85_v61 = vsub.f32 %v424_v10, %v81_v59  ;;  %s226_s19 = sshll.u32 %s377_s3, 4  ;;  %s227_s19 = int_to_ptr.vmem [resolvable:$true] %s226_s19 }
  0x44   :  { %s342_s20 = scalar_lea.vmem %s227_s19, 256  ;;  %p347_p11 = scmp.lt.s32.totalorder %s227_s19, %s227_s19 }
  0x45   :  { %264 = vpow2.f32 %v86_v60  ;;  %v88_v62 = vmul.f32 1.442695, %v85_v61  ;;  %p343_p10 = scmp.ne.s32.totalorder %s227_s19, %s342_s20  ;;  %p348_p12 = scmp.lt.s32.totalorder %s342_s20, %s342_s20 }
  0x47   :  { %266 = vpow2.f32 %v88_v62  ;;  %p349_p13 = por %p348_p12, %p347_p11 }
  0x49   :  { %p350_p0 = pnand %p349_p13, %p343_p10 }
  0x4f   :  { %v265_v63 = vpop.eup %264 }
  0x50   :  { %v92_v0 = vcombine.high %v265_v63, %v265_v63  ;;  %v96_v1 = vsel %vm47_vm0, %v265_v63, 0.0 }
  0x51   :  { %v267_v2 = vpop.eup %266  ;;  %v97_v3 = vrot.slane %v96_v1, 4 }
  0x52   :  { %v103_v4 = vsel %vm47_vm0, %v92_v0, 0.0  ;;  %v93_v5 = vcombine.high %v267_v2, %v267_v2  ;;  %v110_v6 = vsel %vm47_vm0, %v267_v2, 0.0 }
  0x53   :  { %v98_v7 = vadd.f32 %v97_v3, %v96_v1  ;;  %v104_v8 = vrot.slane %v103_v4, 4  ;;  %v111_v9 = vrot.slane %v110_v6, 4 }
  0x54   :  { %v117_v11 = vsel %vm47_vm0, %v93_v5, 0.0 }
  0x55   :  { %v99_v10 = vrot.slane %v98_v7, 2  ;;  %v105_v12 = vadd.f32 %v104_v8, %v103_v4  ;;  %v112_v13 = vadd.f32 %v111_v9, %v110_v6  ;;  %v118_v14 = vrot.slane %v117_v11, 4 }
  0x57   :  { %v100_v15 = vadd.f32 %v99_v10, %v98_v7  ;;  %v106_v16 = vrot.slane %v105_v12, 2  ;;  %v113_v17 = vrot.slane %v112_v13, 2  ;;  %v119_v18 = vadd.f32 %v118_v14, %v117_v11 }
  0x59   :  { %v101_v19 = vrot.slane %v100_v15, 1  ;;  %v107_v20 = vadd.f32 %v106_v16, %v105_v12  ;;  %v114_v21 = vadd.f32 %v113_v17, %v112_v13  ;;  %v120_v22 = vrot.slane %v119_v18, 2 }
  0x5b   :  { %v102_v23 = vadd.f32 %v101_v19, %v100_v15  ;;  %v108_v24 = vrot.slane %v107_v20, 1  ;;  %v115_v25 = vrot.slane %v114_v21, 1  ;;  %v121_v28 = vadd.f32 %v120_v22, %v119_v18 }
  0x5d   :  { %v109_v29 = vadd.f32 %v108_v24, %v107_v20  ;;  %268 = vrcp.f32 %v102_v23  ;;  %v116_v30 = vadd.f32 %v115_v25, %v114_v21  ;;  %v122_v31 = vrot.slane %v121_v28, 1 }
  0x5f   :  { %270 = vrcp.f32 %v109_v29  ;;  %v123_v32 = vadd.f32 %v122_v31, %v121_v28 }
  0x60   :  { %272 = vrcp.f32 %v116_v30 }
  0x61   :  { %274 = vrcp.f32 %v123_v32 }
  0x67   :  { %v269_v33 = vpop.eup %268 }
  0x69   :  { %v271_v35 = vpop.eup %270 }
  0x6a   :  { %v273_v36 = vpop.eup %272  ;;  %v132_v37 = vcombine.low %v269_v33, %v271_v35 }
  0x6b   :  { %v275_v38 = vpop.eup %274 }
  0x6c   :  { %v136_v39 = vmul.f32 %v265_v63, %v132_v37  ;;  %v133_v41 = vcombine.low %v273_v36, %v275_v38 }
  0x6e   :  { %v171_v42 = vcombine.high %v136_v39, %v136_v39  ;;  %v175_v43 = vsub.f32 %v435_v26, %v136_v39  ;;  %v137_v44 = vmul.f32 %v267_v2, %v133_v41 }
  0x70   :  { %v176_v45 = vsub.f32 %v437_v27, %v171_v42  ;;  %v179_v46 = vand.u32 2147483647, %v175_v43  ;;  %v172_v47 = vcombine.high %v137_v44, %v137_v44  ;;  %v177_v48 = vsub.f32 %v440_v34, %v137_v44 }
  0x72   :  { %v180_v49 = vand.u32 2147483647, %v176_v45  ;;  %v178_v50 = vsub.f32 %v444_v40, %v172_v47  ;;  %v181_v51 = vand.u32 2147483647, %v177_v48 }
  0x74   :  { %v187_v52 = vcombine.low %v179_v46, %v180_v49  ;;  %v182_v53 = vand.u32 2147483647, %v178_v50 }
  0x76   :  { %191 = vst [vmem:[#allocation7] sm:$0xff] %v187_v52  ;;  %v188_v54 = vcombine.low %v181_v51, %v182_v53 }
  0x78   :  { %192 = vst [vmem:[#allocation7 + $0x8] sm:$0xff] %v188_v54 }
  0x79   :  { %353 = shalt.err (!%p350_p0)
}
  0x7a   :  { %s354_s23 = scalar_lea.hbm %s484_s2, 256 }
  0x7b   :  { %p355_p1 = scmp.ne.s32.totalorder %s484_s2, %s354_s23  ;;  %p358_p2 = scmp.lt.u32.totalorder %s354_s23, %s484_s2 }
  0x7d   :  { %p360_p3 = pnand %p358_p2, %p355_p1 }
  0x7f   :  { %363 = shalt.err (!%p360_p3)
}
  0x80   :  { %229 = dma.vmem_to_hbm [thread:$0]  %s227_s19, 256, %s484_s2, [#allocation4]  }
  0x81   :  { %368 = dma.done.wait [#allocation4], 256  }
  0x82   :  { %369 = vsyncadd [#allocation4], 4294967040 }
  0x83   :  { %370 = dma.done.wait [#allocation9], 128  }
  0x84   :  { %371 = vsyncadd [#allocation9], 4294967168 }
  0x85   :  { %246 = vsyncpa [#allocation3], 1 }
  0x86   :  { %247 = vsyncpa [#allocation6], 1 }
  0x87   :  { %248 = vsyncpa [#allocation4], 1 }
  0x88   :  { %249 = vsyncpa [#allocation9], 1 }

</bundles_post_ra>
